<compile_context>
chip_gen: v7x
topology: tpu7x:2x2x1
jax: 0.10.0
libtpu: 0.0.40
codegen_flags: <defaults>
</compile_context>

<pallas_src>
import jax
import jax.numpy as jnp
from jax.experimental import pallas as pl
from jax.experimental.pallas import tpu as pltpu

LANE = 128
SUBLANE = 8


def _round_up(x, m):
    return ((x + m - 1) // m) * m


def rnn_fc_kernel(x_ref, w_ih_ref, bias_h_ref, w_fc_ref, b_fc_ref, out_ref):
    # Fused hot path: matmul -> bias -> tanh -> matmul -> bias -> store.
    x = x_ref[...]                                              # (tb, I)

    # MXU-native: contraction dim on LHS lanes / RHS sublanes.
    h = jnp.dot(x, w_ih_ref[...],
                preferred_element_type=jnp.float32)             # (tb, H_pad)
    h = jnp.tanh(h + bias_h_ref[...])                           # f32 VPU + EUP

    o = jnp.dot(h, w_fc_ref[...],
                preferred_element_type=jnp.float32)             # (tb, O)
    out_ref[...] = (o + b_fc_ref[...]).astype(out_ref.dtype)    # narrow store


def prepare_params(w_ih, b_ih, b_hh, w_fc, b_fc):
    """One-time parameter prep (outside the per-call hot path).

    - Transposes weights to MXU-native layout (no in-kernel relayout).
    - Folds the two RNN biases into one row vector.
    - Zero-pads the hidden dim to a 128-lane width (exact, see header).
    """
    H, I = w_ih.shape
    O = w_fc.shape[0]
    h_pad = _round_up(H, LANE)

    w_ih_t = jnp.zeros((I, h_pad), w_ih.dtype).at[:, :H].set(w_ih.T)
    bias_h = jnp.zeros((1, h_pad), b_ih.dtype).at[0, :H].set(b_ih + b_hh)
    w_fc_t = jnp.zeros((h_pad, O), w_fc.dtype).at[:H, :].set(w_fc.T)
    b_fc_r = b_fc.reshape(1, O)
    return w_ih_t, bias_h, w_fc_t, b_fc_r


def _batch_tiling(batch, target=1024):
    """Pick (batch_tile, padded_batch).

    - Tile is a multiple of 8 (sublane), capped near `target` rows.
    - Batch is padded up to a multiple of the tile (never a single huge tile).
    - >= 2 grid steps whenever batch >= 16 so the "parallel" batch axis can be
      sharded across v7x's two TensorCores (near-zero cost on v5e/v6e).
    """
    n_tiles = max(1, -(-batch // target))        # ceil(batch / target)
    if batch >= 2 * SUBLANE:
        n_tiles = max(n_tiles, 2)
    tb = max(SUBLANE, _round_up(-(-batch // n_tiles), SUBLANE))
    b_pad = _round_up(batch, tb)
    return tb, b_pad


def custom_rnn_forward(x, w_ih_t, bias_h, w_fc_t, b_fc_r):
    """x: (B, I). w_ih_t: (I, H_pad). bias_h: (1, H_pad).
       w_fc_t: (H_pad, O). b_fc_r: (1, O)."""
    B, I = x.shape
    h_pad = w_ih_t.shape[1]
    O = w_fc_t.shape[1]

    tb, b_pad = _batch_tiling(B)
    if b_pad != B:
        x = jnp.pad(x, ((0, b_pad - B), (0, 0)))   # padded rows sliced off below
    grid = (b_pad // tb,)

    vmem = pltpu.MemorySpace.VMEM
    in_specs = [
        pl.BlockSpec((tb, I), lambda b: (b, 0), memory_space=vmem),      # x tile
        pl.BlockSpec((I, h_pad), lambda b: (0, 0), memory_space=vmem),   # W_ih^T (resident)
        pl.BlockSpec((1, h_pad), lambda b: (0, 0), memory_space=vmem),   # b_ih+b_hh (resident)
        pl.BlockSpec((h_pad, O), lambda b: (0, 0), memory_space=vmem),   # W_fc^T (resident)
        pl.BlockSpec((1, O), lambda b: (0, 0), memory_space=vmem),       # b_fc (resident)
    ]
    out_specs = pl.BlockSpec((tb, O), lambda b: (b, 0), memory_space=vmem)

    flops = 2 * b_pad * I * h_pad + 2 * b_pad * h_pad * O + b_pad * (h_pad + O)
    bytes_accessed = 4 * (b_pad * I + I * h_pad + h_pad + h_pad * O + O
                          + b_pad * O)
    cost = pl.CostEstimate(flops=flops,
                           transcendentals=b_pad * h_pad,
                           bytes_accessed=bytes_accessed)

    out = pl.pallas_call(
        rnn_fc_kernel,
        out_shape=jax.ShapeDtypeStruct((b_pad, O), x.dtype),
        grid=grid,
        in_specs=in_specs,
        out_specs=out_specs,
        compiler_params=pltpu.CompilerParams(
            dimension_semantics=("parallel",)),   # megacore / v7x 2-TC sharding
        cost_estimate=cost,
    )(x, w_ih_t, bias_h, w_fc_t, b_fc_r)

    return out[:B] if b_pad != B else out


def reference_forward(x, w_ih, b_ih, b_hh, w_fc, b_fc):
    h = jnp.tanh(x @ w_ih.T + b_ih + b_hh)   # h0 == 0, seq_len == 1
    return h @ w_fc.T + b_fc


if __name__ == "__main__":
    input_size, hidden_size, output_size = 16, 32, 8
    batch = 4

    key = jax.random.PRNGKey(0)
    kx, k1, k2, k3, k4, k5 = jax.random.split(key, 6)

    x = jax.random.normal(kx, (batch, input_size), dtype=jnp.float32)

    # Deterministic parameter init (same shapes as nn.RNN / nn.Linear params).
    scale_rnn = 1.0 / jnp.sqrt(hidden_size)
    w_ih = jax.random.uniform(k1, (hidden_size, input_size), jnp.float32,
                              -scale_rnn, scale_rnn)
    b_ih = jax.random.uniform(k2, (hidden_size,), jnp.float32,
                              -scale_rnn, scale_rnn)
    b_hh = jax.random.uniform(k3, (hidden_size,), jnp.float32,
                              -scale_rnn, scale_rnn)
    scale_fc = 1.0 / jnp.sqrt(hidden_size)
    w_fc = jax.random.uniform(k4, (output_size, hidden_size), jnp.float32,
                              -scale_fc, scale_fc)
    b_fc = jax.random.uniform(k5, (output_size,), jnp.float32,
                              -scale_fc, scale_fc)

    # One-time parameter prep (MXU-native transposes, bias fold, H lane-pad).
    w_ih_t, bias_h, w_fc_t, b_fc_r = prepare_params(w_ih, b_ih, b_hh, w_fc, b_fc)

    out = custom_rnn_forward(x, w_ih_t, bias_h, w_fc_t, b_fc_r)
    out = jax.block_until_ready(out)

    ref = reference_forward(x, w_ih, b_ih, b_hh, w_fc, b_fc)
    assert out.shape == (batch, output_size)
    assert jnp.allclose(out, ref, atol=1e-5, rtol=1e-5)

    print("KERNEL_OK")
</pallas_src>

<mosaic_0001>
module attributes {stable_mosaic.version = 11 : i64} {
  func.func @rnn_fc_kernel(%arg0: i32, %arg1: memref<8x16xf32, #tpu.memory_space<vmem>>, %arg2: memref<16x128xf32, #tpu.memory_space<vmem>>, %arg3: memref<1x128xf32, #tpu.memory_space<vmem>>, %arg4: memref<128x8xf32, #tpu.memory_space<vmem>>, %arg5: memref<1x8xf32, #tpu.memory_space<vmem>>, %arg6: memref<8x8xf32, #tpu.memory_space<vmem>>) attributes {dimension_semantics = [#tpu.dimension_semantics<parallel>], iteration_bounds = array<i64: 1>, scalar_prefetch = 0 : i64, scratch_operands = 0 : i64, tpu.core_type = #tpu.core_type<tc>, window_params = [{transform_indices = @transform_0, window_bounds = array<i64: 8, 16>}, {pipeline_mode = #tpu.pipeline_mode<synchronous>, transform_indices = @transform_1, window_bounds = array<i64: 16, 128>}, {pipeline_mode = #tpu.pipeline_mode<synchronous>, transform_indices = @transform_2, window_bounds = array<i64: 1, 128>}, {pipeline_mode = #tpu.pipeline_mode<synchronous>, transform_indices = @transform_3, window_bounds = array<i64: 128, 8>}, {pipeline_mode = #tpu.pipeline_mode<synchronous>, transform_indices = @transform_4, window_bounds = array<i64: 1, 8>}, {transform_indices = @transform_5, window_bounds = array<i64: 8, 8>}]} {
    %c0 = arith.constant 0 : index
    %c0_0 = arith.constant 0 : index
    %0 = vector.load %arg1[%c0, %c0_0] : memref<8x16xf32, #tpu.memory_space<vmem>>, vector<8x16xf32>
    %c0_1 = arith.constant 0 : index
    %c0_2 = arith.constant 0 : index
    %1 = vector.load %arg2[%c0_1, %c0_2] : memref<16x128xf32, #tpu.memory_space<vmem>>, vector<16x128xf32>
    %cst = arith.constant dense<0.000000e+00> : vector<8x128xf32>
    %2 = tpu.matmul %0, %1, %cst {dimension_numbers = #tpu.dot_dimension_numbers<[1], [0], [0], [1], [0, 0, 1, 1], [], []>} : vector<8x16xf32>, vector<16x128xf32>, vector<8x128xf32> -> vector<8x128xf32>
    %c0_3 = arith.constant 0 : index
    %c0_4 = arith.constant 0 : index
    %3 = vector.load %arg3[%c0_3, %c0_4] : memref<1x128xf32, #tpu.memory_space<vmem>>, vector<1x128xf32>
    %4 = vector.broadcast %3 : vector<1x128xf32> to vector<8x128xf32>
    %5 = arith.addf %2, %4 : vector<8x128xf32>
    %6 = math.tanh %5 : vector<8x128xf32>
    %c0_5 = arith.constant 0 : index
    %c0_6 = arith.constant 0 : index
    %7 = vector.load %arg4[%c0_5, %c0_6] : memref<128x8xf32, #tpu.memory_space<vmem>>, vector<128x8xf32>
    %cst_7 = arith.constant dense<0.000000e+00> : vector<8x8xf32>
    %8 = tpu.matmul %6, %7, %cst_7 {dimension_numbers = #tpu.dot_dimension_numbers<[1], [0], [0], [1], [0, 0, 1, 1], [], []>} : vector<8x128xf32>, vector<128x8xf32>, vector<8x8xf32> -> vector<8x8xf32>
    %c0_8 = arith.constant 0 : index
    %c0_9 = arith.constant 0 : index
    %9 = vector.load %arg5[%c0_8, %c0_9] : memref<1x8xf32, #tpu.memory_space<vmem>>, vector<1x8xf32>
    %10 = vector.broadcast %9 : vector<1x8xf32> to vector<8x8xf32>
    %11 = arith.addf %8, %10 : vector<8x8xf32>
    %c0_10 = arith.constant 0 : index
    %c0_11 = arith.constant 0 : index
    %12 = vector.load %arg6[%c0_10, %c0_11] : memref<8x8xf32, #tpu.memory_space<vmem>>, vector<8x8xf32>
    tpu.vector_store %arg6[%c0_10, %c0_11], %11 {strides = array<i32>} : memref<8x8xf32, #tpu.memory_space<vmem>>, vector<8x8xf32>,
    return
  }
  func.func @transform_0(%arg0: i32) -> (i32, i32) {
    %c0_i32 = arith.constant 0 : i32
    %c0_i32_0 = arith.constant 0 : i32
    return %arg0, %c0_i32 : i32, i32
  }
  func.func @transform_1(%arg0: i32) -> (i32, i32) {
    %c0_i32 = arith.constant 0 : i32
    %c0_i32_0 = arith.constant 0 : i32
    %c0_i32_1 = arith.constant 0 : i32
    return %c0_i32, %c0_i32_0 : i32, i32
  }
  func.func @transform_2(%arg0: i32) -> (i32, i32) {
    %c0_i32 = arith.constant 0 : i32
    %c0_i32_0 = arith.constant 0 : i32
    %c0_i32_1 = arith.constant 0 : i32
    return %c0_i32, %c0_i32_0 : i32, i32
  }
  func.func @transform_3(%arg0: i32) -> (i32, i32) {
    %c0_i32 = arith.constant 0 : i32
    %c0_i32_0 = arith.constant 0 : i32
    %c0_i32_1 = arith.constant 0 : i32
    return %c0_i32, %c0_i32_0 : i32, i32
  }
  func.func @transform_4(%arg0: i32) -> (i32, i32) {
    %c0_i32 = arith.constant 0 : i32
    %c0_i32_0 = arith.constant 0 : i32
    %c0_i32_1 = arith.constant 0 : i32
    return %c0_i32, %c0_i32_0 : i32, i32
  }
  func.func @transform_5(%arg0: i32) -> (i32, i32) {
    %c0_i32 = arith.constant 0 : i32
    %c0_i32_0 = arith.constant 0 : i32
    return %arg0, %c0_i32 : i32, i32
  }
}

</mosaic_0001>

<bundles_post_ra>
// kernel: tpu_custom_call.1
= control target key start
LH: loop header
LB: loop body
LE: loop exit
PB: predicated region body
PF: predicated region fallthrough
CT: control target
= control target key end

     0   :  { %v337_v2 = vmov 0.0|0.0   ;;  %vm338_vm0 = vmmov 0   ;;  %v339_v4 = vmov 0.0   ;;  %vm31_vm1 = vcmask 130048   ;;  %s446_s0 = inlined_call_operand.vmem [shape: f32[8,16], index: 0, kind: input, shape index: {}]   ;;  %s447_s1 = inlined_call_operand.vmem [shape: f32[16,128], index: 1, kind: input, shape index: {}]   ;;  %s448_s2 = inlined_call_operand.vmem [shape: f32[1,128], index: 2, kind: input, shape index: {}]   ;;  %s449_s3 = inlined_call_operand.vmem [shape: f32[128,8], index: 3, kind: input, shape index: {}]   ;;  %s450_s4 = inlined_call_operand.vmem [shape: f32[1,8], index: 4, kind: input, shape index: {}]   ;;  %s451_s5 = inlined_call_operand.hbm [shape: f32[8,8], index: 5, kind: output, shape index: {}]  }
   0x1   :  { %v22_v0 = vld [vmem:[%s447_s1] sm:$0xff]  ;;  %v23_v1 = vld [vmem:[%s447_s1 + $0x8] sm:$0xff]  ;;  %280 = vmatprep.subr.bf16.mxu0 %v337_v2  ;;  %242 = vmatprep.mubr.msk.f32.mxu0 %vm338_vm0, %v339_v4  ;;  %v108_v7 = vld [vmem:[%s449_s3 + $0x10] sm:$0xff] }
   0x2   :  { %v281_v3 = vpack.c.bf16 %v23_v1, %v22_v0  ;;  %v106_v5 = vld [vmem:[%s449_s3] sm:$0xff]  ;;  %v107_v6 = vld [vmem:[%s449_s3 + $0x8] sm:$0xff]  ;;  %283 = vmatprep.subr.bf16.mxu1 %v337_v2  ;;  %v109_v9 = vld [vmem:[%s449_s3 + $0x18] sm:$0xff]  ;;  %277 = vmatprep.mubr.msk.f32.mxu1 %vm338_vm0, %v339_v4 }
   0x3   :  { %v284_v8 = vpack.c.bf16 %v107_v6, %v106_v5  ;;  %v21_v10 = vld [vmem:[%s446_s0] sm:$0xff]  ;;  %v287_v11 = vpack.c.bf16 %v109_v9, %v108_v7 }
   0x4   :  { %282 = vmatpush3.bf16.msra.mxu0 %v281_v3 }
   0x5   :  { %285 = vmatpush3.bf16.msra.mxu1 %v284_v8 }
   0x6   :  { %10 = vsyncpa [#allocation3], 0  ;;  %286 = vmatprep.subr.bf16.mxu1 %v337_v2  ;;  %v110_v12 = vld [vmem:[%s449_s3 + $0x20] sm:$0xff]  ;;  %v111_v13 = vld [vmem:[%s449_s3 + $0x28] sm:$0xff]  ;;  %s340_s7 = smov [#allocation2]   ;;  %vm199_vm2 = vcmask 64512  }
   0x7   :  { %243 = vmatmul.mubr.msk.f32.vlgmr.msra.gmra.mrb[0].mxu0 %vm31_vm1, %v21_v10  ;;  %v290_v14 = vpack.c.bf16 %v111_v13, %v110_v12  ;;  %v112_v15 = vld [vmem:[%s449_s3 + $0x30] sm:$0xff]  ;;  %v113_v16 = vld [vmem:[%s449_s3 + $0x38] sm:$0xff]  ;;  %v114_v18 = vld [vmem:[%s449_s3 + $0x40] sm:$0xff] }
   0x8   :  { %v293_v17 = vpack.c.bf16 %v113_v16, %v112_v15  ;;  %v115_v19 = vld [vmem:[%s449_s3 + $0x48] sm:$0xff]  ;;  %v116_v21 = vld [vmem:[%s449_s3 + $0x50] sm:$0xff]  ;;  %v117_v22 = vld [vmem:[%s449_s3 + $0x58] sm:$0xff] }
   0x9   :  { %288 = vmatpush3.bf16.msra.mxu1 %v287_v11  ;;  %v296_v20 = vpack.c.bf16 %v115_v19, %v114_v18  ;;  %v299_v23 = vpack.c.bf16 %v117_v22, %v116_v21  ;;  %v118_v24 = vld [vmem:[%s449_s3 + $0x60] sm:$0xff]  ;;  %v119_v25 = vld [vmem:[%s449_s3 + $0x68] sm:$0xff]  ;;  %v120_v27 = vld [vmem:[%s449_s3 + $0x70] sm:$0xff] }
   0xa   :  { %289 = vmatprep.subr.bf16.mxu1 %v337_v2  ;;  %v302_v26 = vpack.c.bf16 %v119_v25, %v118_v24  ;;  %v121_v28 = vld [vmem:[%s449_s3 + $0x78] sm:$0xff]  ;;  %v215_v30 = vld [vmem:[%s448_s2] ss:$0 sm:$0xff]  ;;  %s207_s3 = sshll.u32 %s340_s7, 4  ;;  %s208_s3 = int_to_ptr.vmem [resolvable:$true] %s207_s3 }
   0xb   :  { %v305_v29 = vpack.c.bf16 %v121_v28, %v120_v27  ;;  %v217_v35 = vld [vmem:[%s450_s4] ss:$0 sm:$0xff]  ;;  %s313_s8 = scalar_lea.vmem %s208_s3, 128  ;;  %p318_p1 = scmp.lt.s32.totalorder %s208_s3, %s208_s3 }
   0xc   :  { %p314_p0 = scmp.ne.s32.totalorder %s208_s3, %s313_s8  ;;  %p319_p2 = scmp.lt.s32.totalorder %s313_s8, %s313_s8 }
   0xd   :  { %291 = vmatpush3.bf16.msra.mxu1 %v290_v14 }
   0xe   :  { %292 = vmatprep.subr.bf16.mxu1 %v337_v2  ;;  %p320_p3 = por %p319_p2, %p318_p1 }
  0x10   :  { %p321_p4 = pnand %p320_p3, %p314_p0 }
  0x11   :  { %294 = vmatpush3.bf16.msra.mxu1 %v293_v17 }
  0x12   :  { %295 = vmatprep.subr.bf16.mxu1 %v337_v2 }
  0x15   :  { %297 = vmatpush3.bf16.msra.mxu1 %v296_v20 }
  0x16   :  { %298 = vmatprep.subr.bf16.mxu1 %v337_v2 }
  0x19   :  { %300 = vmatpush3.bf16.msra.mxu1 %v299_v23 }
  0x1a   :  { %301 = vmatprep.subr.bf16.mxu1 %v337_v2 }
  0x1d   :  { %303 = vmatpush3.bf16.msra.mxu1 %v302_v26 }
  0x1e   :  { %304 = vmatprep.subr.bf16.mxu1 %v337_v2 }
  0x21   :  { %306 = vmatpush3.bf16.msra.mxu1 %v305_v29 }
  0xda   :  { %v101_v31 = vpop.f32.mrb[0].mxu0 }
  0xdb   :  { %v102_v32 = vadd.f32 %v215_v30, %v101_v31  ;;  %v244_v33 = vpop.f32.mrb[1].mxu0 }
  0xdd   :  { %311 = vtanh.f32 %v102_v32 }
  0xe7   :  { %v312_v34 = vpop.eup %311 }
  0xe8   :  { %278 = vmatmul.mubr.f32.vlgmr.msra.gmra.mrb[0].mxu1 %v312_v34 }
 0x1bb   :  { %v195_v36 = vpop.f32.mrb[0].mxu1 }
 0x1bc   :  { %v196_v37 = vadd.f32 %v217_v35, %v195_v36  ;;  %v279_v38 = vpop.f32.mrb[1].mxu1 }
 0x1be   :  { %200 = vst.msk [vmem:[#allocation2] sm:$0xff] %vm199_vm2, %v196_v37 }
 0x1bf   :  { %324 = shalt.err (!%p321_p4)
}
 0x1c0   :  { %s325_s10 = scalar_lea.hbm %s451_s5, 128 }
 0x1c1   :  { %p326_p5 = scmp.ne.s32.totalorder %s451_s5, %s325_s10  ;;  %p329_p6 = scmp.lt.u32.totalorder %s325_s10, %s451_s5 }
 0x1c3   :  { %p331_p7 = pnand %p329_p6, %p326_p5 }
 0x1c5   :  { %334 = shalt.err (!%p331_p7)
}
 0x1c6   :  { %210 = dma.vmem_to_hbm [thread:$0]  %s208_s3, 128, %s451_s5, [#allocation3]  }
 0x1c7   :  { %335 = dma.done.wait [#allocation3], 128  }
 0x1c8   :  { %336 = vsyncadd [#allocation3], 4294967168 }
 0x1c9   :  { %214 = vsyncpa [#allocation3], 1 }

</bundles_post_ra>
